<compile_context>
chip_gen: v7x
topology: tpu7x:2x2x1
jax: 0.10.0
libtpu: 0.0.40
codegen_flags: <defaults>
</compile_context>

<pallas_src>
import jax
import jax.numpy as jnp
from jax.experimental import pallas as pl
from jax.experimental.pallas import tpu as pltpu

_LANE = 128
_HW_TILE_CAP = 1024 * _LANE   # 131072 f32 elems/channel -> ~1.5 MiB per (1, C, tile) block
_MIN_SPLIT_HW = 64 * _LANE    # only force a 2-way HW split when each half >= 8192 elems


def _normalize_kernel(scale_ref, bias_ref, patch_ref, out_ref):
    # scale/bias are (1, C, 1) and broadcast along the lane (H*W) axis:
    # one vmul + one vadd per vreg, no divides, no transcendentals.
    out_ref[...] = patch_ref[...] * scale_ref[...] + bias_ref[...]


def preprocessor(patch, amask):
    N, C, H, W = patch.shape
    assert C == 3, "Preprocessor uses 3-channel ImageNet statistics"
    HW = H * W

    # Constants stored at float16 precision (exactly as the torch module does),
    # then promoted to float32 -- mirrors torch's f32 <op> f16 promotion.
    mean = jnp.array([0.485, 0.456, 0.406], dtype=jnp.float16).astype(jnp.float32)
    std = jnp.array([0.229, 0.224, 0.225], dtype=jnp.float16).astype(jnp.float32)
    # (x/255 - m)/s  ==  x * (1/(255*s)) + (-m/s)   (precomputed at trace time)
    scale = (1.0 / (255.0 * std)).reshape(1, C, 1)
    bias = (-mean / std).reshape(1, C, 1)

    # Lane-dense view: last dim H*W instead of W (free reshape -- array is contiguous).
    patch_r = patch.reshape(N, C, HW)

    # Tile H*W so each block is large (amortize per-step overhead) but bounded
    # (comfortable double-buffering on every chip, including v7x's smaller VMEM).
    hw_tile = HW if HW <= _HW_TILE_CAP else _HW_TILE_CAP  # cap is a multiple of 128
    # Guarantee >= 2 grid steps when there's enough data, so a 2-TC chip (v7x)
    # can shard the "parallel" axes across cores even at batch size 1.
    if N * pl.cdiv(HW, hw_tile) < 2 and HW >= 2 * _MIN_SPLIT_HW:
        hw_tile = pl.cdiv(pl.cdiv(HW, 2), _LANE) * _LANE
    grid = (N, pl.cdiv(HW, hw_tile))

    out_r = pl.pallas_call(
        _normalize_kernel,
        grid=grid,
        in_specs=[
            pl.BlockSpec((1, C, 1), lambda n, t: (0, 0, 0)),        # scale (fetched once)
            pl.BlockSpec((1, C, 1), lambda n, t: (0, 0, 0)),        # bias  (fetched once)
            pl.BlockSpec((1, C, hw_tile), lambda n, t: (n, 0, t)),  # patch tile
        ],
        out_specs=pl.BlockSpec((1, C, hw_tile), lambda n, t: (n, 0, t)),
        out_shape=jax.ShapeDtypeStruct((N, C, HW), jnp.float32),
        compiler_params=pltpu.CompilerParams(
            dimension_semantics=("parallel", "parallel")),
        cost_estimate=pl.CostEstimate(
            flops=2 * N * C * HW,
            transcendentals=0,
            bytes_accessed=2 * 4 * N * C * HW),
    )(scale, bias, patch_r)

    patch_4d = out_r.reshape(N, C, H, W)

    # amask.unsqueeze(0).to(torch.bool): trivial elementwise test left to XLA
    # (fuses for free); a dedicated pallas_call would only add launch overhead.
    amask_3d = (amask != 0)[None]

    return patch_4d, amask_3d


if __name__ == "__main__":
    key = jax.random.PRNGKey(0)
    k_patch, k_mask = jax.random.split(key)

    N, C, H, W = 2, 3, 16, 16  # Preprocessor implies 3 channels (ImageNet stats)
    patch = jax.random.uniform(k_patch, (N, C, H, W), jnp.float32, 0.0, 255.0)
    amask = (jax.random.uniform(k_mask, (H, W), jnp.float32) > 0.5).astype(jnp.float32)

    patch_4d, amask_3d = preprocessor(patch, amask)
    jax.block_until_ready((patch_4d, amask_3d))

    # reference check (pure JAX, literal torch expression)
    mean_ref = jnp.array([0.485, 0.456, 0.406], jnp.float16).astype(jnp.float32).reshape(1, 3, 1, 1)
    std_ref = jnp.array([0.229, 0.224, 0.225], jnp.float16).astype(jnp.float32).reshape(1, 3, 1, 1)
    expected_patch = (patch / 255.0 - mean_ref) / std_ref
    expected_mask = (amask != 0)[None]

    assert patch_4d.shape == (N, C, H, W) and patch_4d.dtype == jnp.float32
    assert amask_3d.shape == (1, H, W) and amask_3d.dtype == jnp.bool_
    assert jnp.allclose(patch_4d, expected_patch, atol=1e-5, rtol=1e-5)
    assert bool(jnp.all(amask_3d == expected_mask))

    print("KERNEL_OK")
</pallas_src>

<mosaic_0001>
module attributes {stable_mosaic.version = 11 : i64} {
  func.func @_normalize_kernel(%arg0: i32, %arg1: i32, %arg2: memref<1x3x1xf32, #tpu.memory_space<vmem>>, %arg3: memref<1x3x1xf32, #tpu.memory_space<vmem>>, %arg4: memref<1x3x256xf32, #tpu.memory_space<vmem>>, %arg5: memref<1x3x256xf32, #tpu.memory_space<vmem>>) attributes {dimension_semantics = [#tpu.dimension_semantics<parallel>, #tpu.dimension_semantics<parallel>], iteration_bounds = array<i64: 2, 1>, scalar_prefetch = 0 : i64, scratch_operands = 0 : i64, tpu.core_type = #tpu.core_type<tc>, window_params = [{pipeline_mode = #tpu.pipeline_mode<synchronous>, transform_indices = @transform_0, window_bounds = array<i64: 1, 3, 1>}, {pipeline_mode = #tpu.pipeline_mode<synchronous>, transform_indices = @transform_1, window_bounds = array<i64: 1, 3, 1>}, {transform_indices = @transform_2, window_bounds = array<i64: 1, 3, 256>}, {transform_indices = @transform_3, window_bounds = array<i64: 1, 3, 256>}]} {
    %c0 = arith.constant 0 : index
    %c0_0 = arith.constant 0 : index
    %c0_1 = arith.constant 0 : index
    %0 = vector.load %arg4[%c0, %c0_0, %c0_1] : memref<1x3x256xf32, #tpu.memory_space<vmem>>, vector<1x3x256xf32>
    %c0_2 = arith.constant 0 : index
    %c0_3 = arith.constant 0 : index
    %c0_4 = arith.constant 0 : index
    %1 = vector.load %arg2[%c0_2, %c0_3, %c0_4] : memref<1x3x1xf32, #tpu.memory_space<vmem>>, vector<1x3x1xf32>
    %2 = vector.broadcast %1 : vector<1x3x1xf32> to vector<1x3x256xf32>
    %3 = arith.mulf %0, %2 : vector<1x3x256xf32>
    %c0_5 = arith.constant 0 : index
    %c0_6 = arith.constant 0 : index
    %c0_7 = arith.constant 0 : index
    %4 = vector.load %arg3[%c0_5, %c0_6, %c0_7] : memref<1x3x1xf32, #tpu.memory_space<vmem>>, vector<1x3x1xf32>
    %5 = vector.broadcast %4 : vector<1x3x1xf32> to vector<1x3x256xf32>
    %6 = arith.addf %3, %5 : vector<1x3x256xf32>
    %c0_8 = arith.constant 0 : index
    %c0_9 = arith.constant 0 : index
    %c0_10 = arith.constant 0 : index
    %7 = vector.load %arg5[%c0_8, %c0_9, %c0_10] : memref<1x3x256xf32, #tpu.memory_space<vmem>>, vector<1x3x256xf32>
    tpu.vector_store %arg5[%c0_8, %c0_9, %c0_10], %6 {strides = array<i32>} : memref<1x3x256xf32, #tpu.memory_space<vmem>>, vector<1x3x256xf32>,
    return
  }
  func.func @transform_0(%arg0: i32, %arg1: i32) -> (i32, i32, i32) {
    %c0_i32 = arith.constant 0 : i32
    %c0_i32_0 = arith.constant 0 : i32
    %c0_i32_1 = arith.constant 0 : i32
    %c0_i32_2 = arith.constant 0 : i32
    return %c0_i32, %c0_i32_0, %c0_i32_1 : i32, i32, i32
  }
  func.func @transform_1(%arg0: i32, %arg1: i32) -> (i32, i32, i32) {
    %c0_i32 = arith.constant 0 : i32
    %c0_i32_0 = arith.constant 0 : i32
    %c0_i32_1 = arith.constant 0 : i32
    %c0_i32_2 = arith.constant 0 : i32
    return %c0_i32, %c0_i32_0, %c0_i32_1 : i32, i32, i32
  }
  func.func @transform_2(%arg0: i32, %arg1: i32) -> (i32, i32, i32) {
    %c0_i32 = arith.constant 0 : i32
    %c0_i32_0 = arith.constant 0 : i32
    return %arg0, %c0_i32, %arg1 : i32, i32, i32
  }
  func.func @transform_3(%arg0: i32, %arg1: i32) -> (i32, i32, i32) {
    %c0_i32 = arith.constant 0 : i32
    %c0_i32_0 = arith.constant 0 : i32
    return %arg0, %c0_i32, %arg1 : i32, i32, i32
  }
}

</mosaic_0001>

<bundles_post_ra>
// kernel: tpu_custom_call.1
= control target key start
LH: loop header
LB: loop body
LE: loop exit
PB: predicated region body
PF: predicated region fallthrough
CT: control target
= control target key end

     0   :  { %s413_s12 = smov 0   ;;  %s415_s13 = smov 0   ;;  %s452_s0 = inlined_call_operand.vmem [shape: f32[1,3,1], index: 0, kind: input, shape index: {}]   ;;  %s453_s1 = inlined_call_operand.vmem [shape: f32[1,3,1], index: 1, kind: input, shape index: {}]   ;;  %s454_s2 = inlined_call_operand.vmem [shape: f32[2,3,256], index: 2, kind: input, shape index: {}]   ;;  %s455_s3 = inlined_call_operand.vmem [shape: f32[2,3,256], index: 3, kind: output, shape index: {}]  }
   0x1   :  { %s417_s14 = smov 0  }
   0x2 LB: > { %s25_s15 = sadd.s32 1, %s385_s13  ;;  %p331_p0 = scmp.ge.s32.totalorder %s389_s14, 1  ;;  %s389_s14 = sphi %s417_s14, %s13_s14   ;;  %s385_s13 = sphi %s415_s13, %s457_s13   ;;  %s381_s12 = sphi %s413_s12, %s456_s12  }
   0x3   : > { %p27_p1 = scmp.ge.s32.totalorder %s25_s15, 2  ;;  %p158_p2 = scmp.lt.s32.totalorder %s389_s14, 3 }
   0x5   : > { %s459_s15 = smov (%p27_p1, %s25_s15), 0  ;;  %p159_p3 = pnand %p331_p0, %p158_p2 }
   0x6   : > { %v211_v0 = vld [vmem:[%s452_s0] sm:$0x7] (!%p159_p3)  ;;  %v391_v1 = vmov (!%p159_p3), 0   ;;  %p191_p4 = scmp.lt.s32.totalorder (!%p159_p3), %s381_s12, 1  ;;  %v392_v3 = vmov (!%p159_p3), 839922192   ;;  %v219_v5 = vlaneseq (!%p159_p3) }
   0x7   : > { %162 = sbr.rel (%p159_p3) target bundleno = 145 (0x91), region = 32  ;;  %366 = vset.pattern.permute.xlu0 (!%p159_p3), %v391_v1  ;;  %v225_v2 = vld [vmem:[%s453_s1] sm:$0x7] (!%p159_p3)  ;;  %v217_v4 = vunpack.c.l.s4 (!%p159_p3), %v392_v3 }
   0x8   : > { %214 = vperm.xlu0 (!%p159_p3), %366, %v211_v0   ;;  %v220_v7 = vshrl.u32 (!%p159_p3), %v219_v5, 7 }
   0x9   : > { %v218_v6 = vunpack.c.0.s8 (!%p159_p3), %v217_v4 }
   0xb   : > { %v221_v8 = vsub.s32 (!%p159_p3), %v218_v6, %v220_v7 }
   0xc   : > { %228 = vperm.xlu0 (!%p159_p3), %366, %v225_v2  }
   0xe   : > { %s461_s12 = smov (!%p191_p4, %s381_s12), 1 }
   0xf   : > { %s338_s20 = sshll.u32 %s461_s12, 3 }
  0x10   : > { %s198_s23 = scalar_lea.vmem %s454_s2, %s338_s20  ;;  %s208_s26 = scalar_lea.vmem %s455_s3, %s338_s20 }
  0x11   : > { %v210_v11 = vld [vmem:[%s198_s23] sm:$0x77] }
  0x87   : > { %v215_v9 = vpop.permute.xlu0 %214 }
  0x88   : > { %v222_v10 = vrot.slane %v215_v9, %v221_v8 }
  0x8a   : > { %v224_v13 = vmul.f32 %v222_v10, %v210_v11 }
  0x8b   : > { %v229_v12 = vpop.permute.xlu0 %228 }
  0x8c   : > { %v236_v14 = vrot.slane %v229_v12, %v221_v8 }
  0x8e   : > { %v238_v15 = vadd.f32 %v236_v14, %v224_v13 }
  0x90   : > { %239 = vst [vmem:[%s208_s26] sm:$0x77] %v238_v15 }
  0x91 PF: > { %s13_s14 = sadd.s32 1, %s389_s14   ;;  %s456_s12 = smov %s385_s13 }
  0x92   : > { %p10_p5 = scmp.ge.s32.totalorder %s13_s14, 4   ;;  %s457_s13 = smov %s459_s15 }
  0x94   :  { %12 = sbr.rel (!%p10_p5) target bundleno = 2 (0x2), region = 62 }

</bundles_post_ra>
